<compile_context>
chip_gen: v5e
topology: v5e:2x2
jax: 0.10.0
libtpu: 0.0.40
codegen_flags: <defaults>
</compile_context>

<pallas_src>
import jax
import jax.numpy as jnp
from jax import lax
from jax.experimental import pallas as pl
from jax.experimental.pallas import tpu as pltpu

_MIB = 1024 * 1024
# Budget for the double-buffered blocks resident in VMEM. Conservative for all
# generations (v7x: 64 MiB physical per TensorCore) while still allowing
# ~1024-token tiles at L<=720, H<=512 in f32.
_VMEM_BLOCK_BUDGET = 20 * _MIB
# v5e's scoped-VMEM default is only 16 MiB -> raise explicitly. 32 MiB fits
# inside the physical VMEM of v5e/v6e (128 MiB) and v7x (64 MiB per TC).
_VMEM_LIMIT_BYTES = 32 * _MIB


def _embed_tokens_kernel(x_ref, w_ref, b_ref, o_ref):
    """One token slab: o = x^T @ w + b.

    x_ref: (L, TN) native-layout slab (L on sublanes, tokens on lanes)
    w_ref: (L, H)  weight as (in_features, out_features)
    b_ref: (1, H)  bias (f32; epilogue math kept in f32 -> v5e-safe)
    o_ref: (TN, H)
    """
    # Transposed-LHS contraction over L (sublane dim) on the MXU with f32
    # accumulation; the folded permute avoids any host-side transpose. If a
    # per-tile vxpose ever appeared it would be hidden behind the HBM-bound
    # DMA (XLU slot is otherwise idle here).
    acc = lax.dot_general(
        x_ref[...], w_ref[...],
        dimension_numbers=(((0,), (0,)), ((), ())),
        preferred_element_type=jnp.float32,
    )
    o_ref[...] = (acc + b_ref[...].astype(jnp.float32)).astype(o_ref.dtype)


def _embed_split_kernel(x_ref, m_ref, w_ref, b_ref, o_ref):
    """x and x_mark as separate inputs -> no HBM concat in the wrapper.

    x_ref: (L, Nv), m_ref: (L, Nm), w_ref: (L, H), b_ref: (1, H)
    o_ref: (Nv + Nm, H): rows [0, Nv) from x, rows [Nv, Nv+Nm) from x_mark.
    """
    dn = (((0,), (0,)), ((), ()))
    acc_v = lax.dot_general(x_ref[...], w_ref[...], dn,
                            preferred_element_type=jnp.float32)
    acc_m = lax.dot_general(m_ref[...], w_ref[...], dn,
                            preferred_element_type=jnp.float32)
    acc = jnp.concatenate([acc_v, acc_m], axis=0)        # in-register concat
    o_ref[...] = (acc + b_ref[...].astype(jnp.float32)).astype(o_ref.dtype)


def _pick_token_tile(n_tok, l, h, in_bytes, out_bytes, w_bytes):
    """Largest token tile fitting the double-buffered VMEM block budget."""
    fixed = 2 * l * h * w_bytes + 2 * h * 4              # weight + bias blocks
    avail = max(_VMEM_BLOCK_BUDGET - fixed, 2 * _MIB)
    per_tok = 2 * l * in_bytes + 2 * h * out_bytes        # x column + out row
    if n_tok * per_tok <= avail:
        return n_tok               # full token dim: no padding, no partial tiles
    tn = (avail // per_tok) // 128 * 128
    return int(max(128, min(1024, tn)))


def _tokens_linear(tokens, w_t, b2d, out_dtype, token_tile, fuse_input):
    """(B, L, N) tokens -> (B, N, H) via the tiled single-input kernel."""
    B, L, N = tokens.shape
    H = w_t.shape[1]
    if token_tile is None:
        tn = _pick_token_tile(N, L, H, tokens.dtype.itemsize,
                              jnp.dtype(out_dtype).itemsize,
                              w_t.dtype.itemsize)
    else:
        tn = int(token_tile)
    tn = min(tn, N)
    if tn != N and tn % 128 != 0:   # keep lane-aligned tiles when actually tiling
        tn = max(128, (tn // 128) * 128)
        tn = min(tn, N)
    n_tiles = pl.cdiv(N, tn)
    # One flat "parallel" axis so both v7x TensorCores get several steps even
    # for small batch; partial last token tile (N % tn != 0) uses Pallas's
    # masked OOB stores -- no wrapper-side padding or epilogue slice.
    grid = (B * n_tiles,)

    return pl.pallas_call(
        _embed_tokens_kernel,
        out_shape=jax.ShapeDtypeStruct((B, N, H), out_dtype),
        grid=grid,
        in_specs=[
            pl.BlockSpec((None, L, tn),
                         lambda g: (g // n_tiles, 0, g % n_tiles)),
            # Constant index maps: weight / bias fetched once, VMEM-resident.
            pl.BlockSpec((L, H), lambda g: (0, 0)),
            pl.BlockSpec((1, H), lambda g: (0, 0)),
        ],
        out_specs=pl.BlockSpec((None, tn, H),
                               lambda g: (g // n_tiles, g % n_tiles, 0)),
        compiler_params=pltpu.CompilerParams(
            dimension_semantics=("parallel",),
            vmem_limit_bytes=_VMEM_LIMIT_BYTES,
            # Allow XLA to fuse a wrapper-side producer (bf16 cast / fallback
            # concat) into the pallas input DMA instead of materializing it.
            allow_input_fusion=[fuse_input, False, False],
        ),
    )(tokens, w_t, b2d)


def data_embedding_inverted(x, x_mark, weight, bias, *, compute_dtype=None,
                            out_dtype=None, token_tile=None):
    """Forward pass of DataEmbedding_inverted (eval mode; dropout = identity).

    x:      (B, L, N_vars)
    x_mark: (B, L, N_mark) or None
    weight: (H, c_in) with c_in == L  (PyTorch nn.Linear layout)
    bias:   (H,)
    compute_dtype: optional reduced precision for x / x_mark / weight
        (jnp.bfloat16 recommended on v6e/v7x: ~2x less HBM read traffic on a
        bandwidth-bound op; accumulation stays f32 on the MXU, so results
        differ from the f32 reference only at ~1e-2 relative tolerance).
    returns (B, N_vars [+ N_mark], H) in out_dtype (default: x.dtype).
    """
    B, L, Nv = x.shape
    H, c_in = weight.shape
    if c_in != L:
        raise ValueError("nn.Linear in_features must equal sequence length L")
    if out_dtype is None:
        out_dtype = x.dtype

    # Parameter-side reshapes only (one tiny pass over L*H weight elements).
    w_t = jnp.transpose(weight)                       # (L, H)
    b2d = bias.reshape(1, H).astype(jnp.float32)      # epilogue stays f32

    fuse = compute_dtype is not None
    if compute_dtype is not None:
        x = x.astype(compute_dtype)
        w_t = w_t.astype(compute_dtype)
        if x_mark is not None:
            x_mark = x_mark.astype(compute_dtype)

    if x_mark is None:
        return _tokens_linear(x, w_t, b2d, out_dtype, token_tile, fuse)

    Nm = x_mark.shape[2]
    N_tok = Nv + Nm
    in_b = jnp.dtype(x.dtype).itemsize
    out_b = jnp.dtype(out_dtype).itemsize
    w_b = jnp.dtype(w_t.dtype).itemsize
    # Double-buffered VMEM footprint of one per-batch step of the split kernel.
    est = (2 * L * N_tok * in_b            # x + x_mark blocks
           + 2 * L * H * w_b + 2 * H * 4   # weight + bias blocks
           + 2 * N_tok * H * out_b)        # output block
    if est <= _VMEM_BLOCK_BUDGET:
        # Common iTransformer case: one grid step per batch covers the whole
        # token axis -- no concat, no token/H padding, no epilogue slice.
        return pl.pallas_call(
            _embed_split_kernel,
            out_shape=jax.ShapeDtypeStruct((B, N_tok, H), out_dtype),
            grid=(B,),
            in_specs=[
                pl.BlockSpec((None, L, Nv), lambda b: (b, 0, 0)),
                pl.BlockSpec((None, L, Nm), lambda b: (b, 0, 0)),
                pl.BlockSpec((L, H), lambda b: (0, 0)),
                pl.BlockSpec((1, H), lambda b: (0, 0)),
            ],
            out_specs=pl.BlockSpec((None, N_tok, H), lambda b: (b, 0, 0)),
            compiler_params=pltpu.CompilerParams(
                dimension_semantics=("parallel",),
                vmem_limit_bytes=_VMEM_LIMIT_BYTES,
                allow_input_fusion=[fuse, fuse, False, False],
            ),
        )(x, x_mark, w_t, b2d)

    # Rare fallback (very large N_vars): native layout makes permute+cat(dim=1)
    # a cheap last-axis concat; allow_input_fusion lets XLA fuse it into the
    # kernel's input DMA rather than materializing an extra HBM copy.
    tokens = jnp.concatenate([x, x_mark], axis=2)
    return _tokens_linear(tokens, w_t, b2d, out_dtype, token_tile, True)


# TODO(synk): training-mode dropout (stochastic masking via pltpu.prng_seed /
# pltpu.prng_random_bits) is not implemented; eval-mode identity only.


if __name__ == "__main__":
    key = jax.random.PRNGKey(0)
    k_x, k_m, k_w, k_b = jax.random.split(key, 4)

    # Small shapes: batch=2, seq_len (= c_in) = 16, n_vars=4, n_mark=3, hidden=32
    B, L, Nv, Nm, H = 2, 16, 4, 3, 32

    x = jax.random.normal(k_x, (B, L, Nv), dtype=jnp.float32)
    x_mark = jax.random.normal(k_m, (B, L, Nm), dtype=jnp.float32)

    bound = 1.0 / (L ** 0.5)
    weight = jax.random.uniform(k_w, (H, L), jnp.float32, -bound, bound)
    bias = jax.random.uniform(k_b, (H,), jnp.float32, -bound, bound)

    # f32 path (exact PyTorch-parity semantics).
    fwd = jax.jit(data_embedding_inverted)
    out = jax.block_until_ready(fwd(x, x_mark, weight, bias))

    tokens_ref = jnp.concatenate(
        [jnp.transpose(x, (0, 2, 1)), jnp.transpose(x_mark, (0, 2, 1))], axis=1
    )
    ref = tokens_ref @ weight.T + bias
    assert out.shape == (B, Nv + Nm, H)
    assert jnp.allclose(out, ref, atol=1e-5, rtol=1e-5)

    # x_mark = None branch (single-input tiled path, full-dim token block).
    out2 = jax.block_until_ready(data_embedding_inverted(x, None, weight, bias))
    ref2 = jnp.transpose(x, (0, 2, 1)) @ weight.T + bias
    assert out2.shape == (B, Nv, H)
    assert jnp.allclose(out2, ref2, atol=1e-5, rtol=1e-5)

    # bf16 compute path (recommended on v6e/v7x) -- f32 accumulation, looser
    # tolerance versus the f32 reference.
    out3 = jax.block_until_ready(
        data_embedding_inverted(x, x_mark, weight, bias,
                                compute_dtype=jnp.bfloat16))
    assert out3.shape == (B, Nv + Nm, H)
    assert jnp.allclose(out3, ref, atol=5e-2, rtol=5e-2)

    print("KERNEL_OK")
</pallas_src>

<mosaic_0001>
module attributes {stable_mosaic.version = 11 : i64} {
  func.func @_embed_split_kernel(%arg0: i32, %arg1: memref<1x16x4xf32, #tpu.memory_space<vmem>>, %arg2: memref<1x16x3xf32, #tpu.memory_space<vmem>>, %arg3: memref<16x32xf32, #tpu.memory_space<vmem>>, %arg4: memref<1x32xf32, #tpu.memory_space<vmem>>, %arg5: memref<1x7x32xf32, #tpu.memory_space<vmem>>) attributes {dimension_semantics = [#tpu.dimension_semantics<parallel>], iteration_bounds = array<i64: 2>, scalar_prefetch = 0 : i64, scratch_operands = 0 : i64, tpu.core_type = #tpu.core_type<tc>, window_params = [{transform_indices = @transform_0, window_bounds = array<i64: 1, 16, 4>}, {transform_indices = @transform_1, window_bounds = array<i64: 1, 16, 3>}, {pipeline_mode = #tpu.pipeline_mode<synchronous>, transform_indices = @transform_2, window_bounds = array<i64: 16, 32>}, {pipeline_mode = #tpu.pipeline_mode<synchronous>, transform_indices = @transform_3, window_bounds = array<i64: 1, 32>}, {transform_indices = @transform_4, window_bounds = array<i64: 1, 7, 32>}]} {
    %c0 = arith.constant 0 : index
    %c0_0 = arith.constant 0 : index
    %c0_1 = arith.constant 0 : index
    %0 = vector.load %arg1[%c0, %c0_0, %c0_1] : memref<1x16x4xf32, #tpu.memory_space<vmem>>, vector<1x16x4xf32>
    %1 = vector.shape_cast %0 : vector<1x16x4xf32> to vector<16x4xf32>
    %c0_2 = arith.constant 0 : index
    %c0_3 = arith.constant 0 : index
    %2 = vector.load %arg3[%c0_2, %c0_3] : memref<16x32xf32, #tpu.memory_space<vmem>>, vector<16x32xf32>
    %cst = arith.constant dense<0.000000e+00> : vector<4x32xf32>
    %3 = tpu.matmul %1, %2, %cst {dimension_numbers = #tpu.dot_dimension_numbers<[0], [0], [1], [1], [0, 1, 1, 1], [], []>} : vector<16x4xf32>, vector<16x32xf32>, vector<4x32xf32> -> vector<4x32xf32>
    %c0_4 = arith.constant 0 : index
    %c0_5 = arith.constant 0 : index
    %c0_6 = arith.constant 0 : index
    %4 = vector.load %arg2[%c0_4, %c0_5, %c0_6] : memref<1x16x3xf32, #tpu.memory_space<vmem>>, vector<1x16x3xf32>
    %5 = vector.shape_cast %4 : vector<1x16x3xf32> to vector<16x3xf32>
    %c0_7 = arith.constant 0 : index
    %c0_8 = arith.constant 0 : index
    %6 = vector.load %arg3[%c0_7, %c0_8] : memref<16x32xf32, #tpu.memory_space<vmem>>, vector<16x32xf32>
    %cst_9 = arith.constant dense<0.000000e+00> : vector<3x32xf32>
    %7 = tpu.matmul %5, %6, %cst_9 {dimension_numbers = #tpu.dot_dimension_numbers<[0], [0], [1], [1], [0, 1, 1, 1], [], []>} : vector<16x3xf32>, vector<16x32xf32>, vector<3x32xf32> -> vector<3x32xf32>
    %8 = tpu.concatenate %3, %7 in 0 : vector<4x32xf32>, vector<3x32xf32> -> vector<7x32xf32>
    %c0_10 = arith.constant 0 : index
    %c0_11 = arith.constant 0 : index
    %9 = vector.load %arg4[%c0_10, %c0_11] : memref<1x32xf32, #tpu.memory_space<vmem>>, vector<1x32xf32>
    %10 = vector.broadcast %9 : vector<1x32xf32> to vector<7x32xf32>
    %11 = arith.addf %8, %10 : vector<7x32xf32>
    %c0_12 = arith.constant 0 : index
    %c0_13 = arith.constant 0 : index
    %c0_14 = arith.constant 0 : index
    %12 = vector.load %arg5[%c0_12, %c0_13, %c0_14] : memref<1x7x32xf32, #tpu.memory_space<vmem>>, vector<1x7x32xf32>
    %13 = vector.shape_cast %12 : vector<1x7x32xf32> to vector<7x32xf32>
    %14 = vector.shape_cast %11 : vector<7x32xf32> to vector<1x7x32xf32>
    tpu.vector_store %arg5[%c0_12, %c0_13, %c0_14], %14 {strides = array<i32>} : memref<1x7x32xf32, #tpu.memory_space<vmem>>, vector<1x7x32xf32>,
    return
  }
  func.func @transform_0(%arg0: i32) -> (i32, i32, i32) {
    %c0_i32 = arith.constant 0 : i32
    %c0_i32_0 = arith.constant 0 : i32
    %c0_i32_1 = arith.constant 0 : i32
    return %arg0, %c0_i32, %c0_i32_0 : i32, i32, i32
  }
  func.func @transform_1(%arg0: i32) -> (i32, i32, i32) {
    %c0_i32 = arith.constant 0 : i32
    %c0_i32_0 = arith.constant 0 : i32
    %c0_i32_1 = arith.constant 0 : i32
    return %arg0, %c0_i32, %c0_i32_0 : i32, i32, i32
  }
  func.func @transform_2(%arg0: i32) -> (i32, i32) {
    %c0_i32 = arith.constant 0 : i32
    %c0_i32_0 = arith.constant 0 : i32
    %c0_i32_1 = arith.constant 0 : i32
    return %c0_i32, %c0_i32_0 : i32, i32
  }
  func.func @transform_3(%arg0: i32) -> (i32, i32) {
    %c0_i32 = arith.constant 0 : i32
    %c0_i32_0 = arith.constant 0 : i32
    %c0_i32_1 = arith.constant 0 : i32
    return %c0_i32, %c0_i32_0 : i32, i32
  }
  func.func @transform_4(%arg0: i32) -> (i32, i32, i32) {
    %c0_i32 = arith.constant 0 : i32
    %c0_i32_0 = arith.constant 0 : i32
    %c0_i32_1 = arith.constant 0 : i32
    return %arg0, %c0_i32, %c0_i32_0 : i32, i32, i32
  }
}

</mosaic_0001>

<bundles_post_ra>
// kernel: data_embedding_inverted.1
= control target key start
LH: loop header
LB: loop body
LE: loop exit
PB: predicated region body
PF: predicated region fallthrough
CT: control target
= control target key end

     0   :  { %s469_s15 = smov 0   ;;  %s498_s0 = inlined_call_operand.vmem [shape: f32[2,16,4], index: 0, kind: input, shape index: {}]   ;;  %s499_s1 = inlined_call_operand.vmem [shape: f32[2,16,3], index: 1, kind: input, shape index: {}]   ;;  %s500_s2 = inlined_call_operand.vmem [shape: f32[16,32], index: 2, kind: input, shape index: {}]   ;;  %s501_s3 = inlined_call_operand.vmem [shape: f32[1,32], index: 3, kind: input, shape index: {}]   ;;  %s502_s4 = inlined_call_operand.vmem [shape: f32[2,7,32], index: 4, kind: output, shape index: {}]  }
   0x1 LB: > { %s410_s16 = sadd.s32 4294967295, %s442_s15   ;;  %p414_p0 = scmp.ge.s32.totalorder %s442_s15, 1  ;;  %s442_s15 = sphi %s469_s15, %s14_s15  }
   0x2   : > { %p172_p1 = scmp.lt.s32.totalorder %s442_s15, 3 }
   0x4   : > { %p173_p2 = pnand %p414_p0, %p172_p1 }
   0x5   : > { %p202_p3 = scmp.lt.s32.totalorder (!%p173_p2), %s410_s16, 1 }
   0x6   : > { %176 = sbr.rel (%p173_p2) target bundleno = 312 (0x138), region = 36 }
   0xb   : > { %v219_v0 = vld [vmem:[%s500_s2 + $0x8] sm:$0xff]  ;;  %v218_v1 = vld [vmem:[%s500_s2] sm:$0xff]  ;;  %s504_s16 = smov (!%p202_p3, %s410_s16), 1  ;;  %vm252_vm0 = vcmask 130048   ;;  %vm336_vm1 = vcmask 1043456   ;;  %vm343_vm2 = vcmask 260096  }
   0xc   : > { %327 = vmatpush.msra.mxu1 %v219_v0  ;;  %270 = vmatpush.msra.mxu0 %v219_v0  ;;  %s424_s21 = sshll.u32 %s504_s16, 4  ;;  %s419_s28 = sshll.u32 %s504_s16, 3  ;;  %v435_v9 = vld [vmem:[%s501_s3] ss:$0 sm:$0xff] }
   0xd   : > { %s211_s24 = scalar_lea.vmem %s499_s1, %s424_s21  ;;  %s206_s27 = scalar_lea.vmem %s498_s0, %s424_s21 }
   0xe   : > { %328 = vmatpush.msra.mxu1 %v218_v1  ;;  %271 = vmatpush.msra.mxu0 %v218_v1  ;;  %v276_v2 = vld [vmem:[%s211_s24] sm:$0xff]  ;;  %v277_v4 = vld [vmem:[%s211_s24 + $0x8] sm:$0xff]  ;;  %s215_s7 = scalar_lea.vmem %s502_s4, %s419_s28 }
   0xf   : > { %278 = vxpose.xlu0.b32.start [1/2] (short) (narrow) %v276_v2, 8  ;;  %v216_v3 = vld [vmem:[%s206_s27] sm:$0xff]  ;;  %v217_v5 = vld [vmem:[%s206_s27 + $0x8] sm:$0xff] }
  0x10   : > { %220 = vxpose.xlu1.b32.start [1/2] (short) (narrow) %v216_v3, 8 }
  0x17   : > { %279 = vxpose.xlu0.b32.end [2/2] (short) (narrow) %v277_v4, 8 }
  0x18   : > { %221 = vxpose.xlu1.b32.end [2/2] (short) (narrow) %v217_v5, 8 }
  0xb3   : > { %v294_v6 = vpop.trf.xlu0 }
  0xb4   : > { %421 = vmatmul.msk.f32.vlgmr.msra.gmra.mxu1 %vm252_vm0, %v294_v6  ;;  %v236_v7 = vpop.trf.xlu1 }
  0xb5   : > { %420 = vmatmul.msk.f32.vlgmr.msra.gmra.mxu0 %vm252_vm0, %v236_v7 }
 0x131   : > { %v330_v8 = vpop.f32.mrf.mxu1 }
 0x132   : > { %v334_v10 = vrot.slane %v330_v8, 4  ;;  %v273_v11 = vpop.f32.mrf.mxu0 }
 0x134   : > { %v337_v12 = vsel %vm336_vm1, %v273_v11, %v334_v10 }
 0x135   : > { %v342_v13 = vadd.f32 %v435_v9, %v337_v12 }
 0x137   : > { %344 = vst.msk [vmem:[%s215_s7] sm:$0x7f] %vm343_vm2, %v342_v13 }
 0x138 PF: > { %s14_s15 = sadd.s32 1, %s442_s15  }
 0x139   : > { %p11_p4 = scmp.ge.s32.totalorder %s14_s15, 4  }
 0x13b   :  { %13 = sbr.rel (!%p11_p4) target bundleno = 1 (0x1), region = 69 }

</bundles_post_ra>
